<compile_context>
chip_gen: v7x
topology: tpu7x:2x2x1
jax: 0.10.0
libtpu: 0.0.40
codegen_flags: <defaults>
</compile_context>

<pallas_src>
import jax
import jax.numpy as jnp
from jax import lax
from jax.experimental import pallas as pl
from jax.experimental.pallas import tpu as pltpu

# config / problem sizes
D = 32          # n_embd
H = 4           # n_head
HEAD = D // H   # head dim
N = 16          # nodes per graph
E = 8           # edges per graph
B = 2           # batch
EPS = 1e-5      # layer_norm_epsilon
BN = B * N
BE = B * E
R = H * BE      # attention score columns (head-blocked)


def _layer_norm(x, g, b):
    mu = jnp.mean(x, axis=-1, keepdims=True)
    var = jnp.mean((x - mu) ** 2, axis=-1, keepdims=True)
    return (x - mu) * lax.rsqrt(var + EPS) * g + b


def transformer_conv_kernel(x_ref, idx_ref, ea_ref, invc_ref, msk_ref, vec_ref,
                            w_hbm_ref, out_ref, w_vmem, w_sem):
    f32 = jnp.float32

    # Kick off the 80 KB weight-slab DMA immediately; weights are not needed
    # until the fused q/kv projection, so ln1/ln2, the one-hot build and the
    # gather matmul overlap with it.
    w_copy = pltpu.make_async_copy(w_hbm_ref, w_vmem, w_sem)
    w_copy.start()

    x = x_ref[...]                         # (BN, D)   all nodes, both graphs
    ea = ea_ref[...]                       # (BE, D)   all edges, both graphs
    idx = idx_ref[...]                     # (2BE, 1)  int32: [tgt_global ; src_global]
    vec = vec_ref[...]                     # (16, 128) packed LN gains/biases + linear biases
    msk = msk_ref[...]                     # (144, 64) packed static masks

    ln1g, ln1b = vec[0:1, 0:D], vec[1:2, 0:D]
    ln2g, ln2b = vec[2:3, 0:D], vec[3:4, 0:D]
    ln3g, ln3b = vec[4:5, 0:D], vec[5:6, 0:D]
    b_proj = vec[6:7, :]                   # [bq+be | bkv | 0]  (1, 128)
    b1 = vec[7:8, :]                       # (1, 128)
    b2 = vec[8:9, 0:D]                     # (1, 32)

    head_mask2 = msk[0:R, :]               # (R, 2D)  block-diag head mask for [k|v]
    blk_ones = msk[R:2 * R, :]             # (R, R)   per-head-block all-ones
    batch_bias = msk[2 * R:2 * R + BE, :]  # (BE, R)  0 same-batch / -1e30 cross-batch

    # ln1 over all B*N nodes, ln2 over all B*E edges (no weights needed yet)
    xn = _layer_norm(x, ln1g, ln1b)        # (BN, D)
    ea_n = _layer_norm(ea, ln2g, ln2b)     # (BE, D)

    # fused one-hot gather: rows [0,BE) -> x[tgt], rows [BE,2BE) -> x[src]
    oh = (lax.broadcasted_iota(jnp.int32, (2 * BE, BN), 1) == idx).astype(f32)
    gathered = jnp.dot(oh, xn, preferred_element_type=f32)        # (2BE, D)
    q_nodes = gathered[0:BE, :]
    k_nodes = gathered[BE:2 * BE, :]
    oh_tgt = oh[0:BE, :]                                          # reused for scatter

    # fused lin_q + lin_edge + lin_kv input
    qek = jnp.concatenate([q_nodes, ea_n, k_nodes], axis=1)       # (BE, 3D)

    # weights now required: block until the manual DMA is done
    w_copy.wait()
    w_fused = w_vmem[0:3 * D, :]           # (96, 128): cols 0:D <- [wq;we], D:3D <- wkv
    w1 = w_vmem[3 * D:4 * D, :]            # (32, 128)
    w2t = w_vmem[4 * D:5 * D, :]           # (32, 128) = w2^T

    proj = jnp.dot(qek, w_fused, preferred_element_type=f32) + b_proj   # (BE, 128)
    q = proj[:, 0:D]                       # lin_q(x[tgt]) + lin_edge(ln2(edge_attr))
    kv = proj[:, D:3 * D]                  # (BE, 2D) = [k_join | v_join]
    v_join = proj[:, 2 * D:3 * D]          # (BE, D)

    # ---- all-head, all-batch attention via masked block-diagonal K/V slab ----
    kv_blk = jnp.concatenate([kv] * H, axis=0) * head_mask2       # (R, 2D)
    k_blk = kv_blk[:, 0:D]                                        # (R, D)
    v_blk = kv_blk[:, D:2 * D]                                    # (R, D)

    scale = 1.0 / (float(HEAD) ** 0.5)
    scores = lax.dot_general(q, k_blk, (((1,), (1,)), ((), ())),
                             preferred_element_type=f32) * scale + batch_bias  # (BE, R)

    m = jnp.max(scores, axis=-1, keepdims=True)   # per-row shift; masked cols can't win
    p = jnp.exp(scores - m)                       # masked entries underflow to exactly 0

    # per-head-block softmax denominator, broadcast back in ONE matmul
    den = jnp.maximum(jnp.dot(p, blk_ones, preferred_element_type=f32), 1e-30)  # (BE, R)
    inv = pl.reciprocal(den, approx=True)
    inv = inv * (2.0 - den * inv)                 # Newton step 1
    inv = inv * (2.0 - den * inv)                 # Newton step 2 (near-exact)
    p = p * inv
    a = jnp.dot(p, v_blk, preferred_element_type=f32)             # (BE, D) merged heads

    # hidden = ln3(v + a); MLP (Linear -> ReLU -> Linear); residual
    hidden = _layer_norm(v_join + a, ln3g, ln3b)
    h1 = jnp.maximum(jnp.dot(hidden, w1, preferred_element_type=f32) + b1, 0.0)
    hidden = lax.dot_general(h1, w2t, (((1,), (1,)), ((), ())),
                             preferred_element_type=f32) + b2 + hidden   # (BE, D)

    # scatter_mean over global target node: sums via one-hot^T matmul,
    # mean via precomputed inverse counts (computed in the XLA wrapper)
    sums = lax.dot_general(oh_tgt, hidden, (((0,), (0,)), ((), ())),
                           preferred_element_type=f32)                   # (BN, D)
    mean = sums * invc_ref[...]                                          # (BN,1) broadcast

    # x = where(hidden != 0, hidden, ln1(x_orig))
    out_ref[...] = jnp.where(mean != 0.0, mean, xn)


def pack_params(p):
    """One-time (init-time) packing of the 16 parameter tensors into two slabs."""
    f32 = jnp.float32

    # fused projection block weight: rows = [q_nodes ; ea_n ; k_nodes] inputs,
    # cols 0:D -> q, cols D:3D -> kv, cols 3D:4D -> unused (zero)
    w_fused = jnp.zeros((3 * D, 4 * D), f32)
    w_fused = w_fused.at[0:D, 0:D].set(jnp.asarray(p["wq"], f32))
    w_fused = w_fused.at[D:2 * D, 0:D].set(jnp.asarray(p["we"], f32))
    w_fused = w_fused.at[2 * D:3 * D, D:3 * D].set(jnp.asarray(p["wkv"], f32))
    w_slab = jnp.concatenate([
        w_fused,                               # rows [0, 3D)
        jnp.asarray(p["w1"], f32),             # rows [3D, 4D)   (D, 4D) = (32, 128)
        jnp.asarray(p["w2"], f32).T,           # rows [4D, 5D)   w2^T   = (32, 128)
    ], axis=0)                                 # (160, 128)  ~80 KB (was 128 KB)

    def row(v):
        v = jnp.asarray(v, f32).reshape(1, -1)
        return jnp.pad(v, ((0, 0), (0, 4 * D - v.shape[1])))

    b_proj = jnp.concatenate([
        jnp.asarray(p["bq"] + p["be"], f32).reshape(1, -1),   # fused lin_q/lin_edge bias
        jnp.asarray(p["bkv"], f32).reshape(1, -1),
    ], axis=1)                                                 # (1, 3D)

    vec = jnp.concatenate([
        row(p["ln1_g"]), row(p["ln1_b"]),
        row(p["ln2_g"]), row(p["ln2_b"]),
        row(p["ln3_g"]), row(p["ln3_b"]),
        row(b_proj), row(p["b1"]), row(p["b2"]),
        jnp.zeros((7, 4 * D), f32),            # pad rows -> 16
    ], axis=0)                                 # (16, 128)
    return w_slab, vec


def _static_masks():
    """Static (shape-only) masks, hoisted out of the kernel. Packed into one slab."""
    f32 = jnp.float32
    r = jnp.arange(R)
    c2 = jnp.arange(2 * D)
    # block-diag head mask for the [k|v] slab
    head_mask2 = ((r[:, None] // BE) == ((c2[None, :] % D) // HEAD)).astype(f32)  # (R, 2D)
    # per-head-block all-ones (softmax denominator broadcast)
    blk_ones = ((r[:, None] // BE) == (r[None, :] // BE)).astype(f32)             # (R, R)
    # additive cross-batch bias
    e_idx = jnp.arange(BE)
    batch_bias = jnp.where((e_idx[:, None] // E) == ((r[None, :] % BE) // E),
                           0.0, -1e30).astype(f32)                                # (BE, R)
    return jnp.concatenate([head_mask2, blk_ones, batch_bias], axis=0)            # (144, 64)


@jax.jit
def transformer_conv_block(w_slab, vec, x_orig, edge_index, edge_attr):
    """Mirrors TransformerConvBlock.forward; returns (x_out, edge_index, edge_attr)."""
    b, n, d = x_orig.shape
    e = edge_attr.shape[1]

    # index plumbing: global (batch-offset) endpoints, row order = [all tgt ; all src]
    offs = (jnp.arange(b, dtype=jnp.int32) * n)[:, None]
    tgt_g = (edge_index[:, 1, :].astype(jnp.int32) + offs).reshape(-1)
    src_g = (edge_index[:, 0, :].astype(jnp.int32) + offs).reshape(-1)
    idx_col = jnp.concatenate([tgt_g, src_g]).reshape(2 * b * e, 1)

    # inverse in-degree counts for scatter_mean (trivial segment-sum in XLA)
    cnt = jnp.zeros((b * n,), jnp.float32).at[tgt_g].add(1.0)
    inv_cnt = (1.0 / jnp.maximum(cnt, 1.0)).reshape(b * n, 1)

    x_flat = x_orig.reshape(b * n, d).astype(jnp.float32)
    ea_flat = edge_attr.reshape(b * e, d).astype(jnp.float32)
    masks = _static_masks()

    def full(arr):
        return pl.BlockSpec(arr.shape, lambda i: (0,) * arr.ndim)

    out = pl.pallas_call(
        transformer_conv_kernel,
        out_shape=jax.ShapeDtypeStruct((b * n, d), jnp.float32),
        grid_spec=pltpu.PrefetchScalarGridSpec(
            num_scalar_prefetch=0,
            grid=(1,),                   # single step: whole problem is VMEM-resident
            in_specs=[full(x_flat), full(idx_col), full(ea_flat),
                      full(inv_cnt), full(masks), full(vec),
                      pl.BlockSpec(memory_space=pl.ANY)],   # weight slab: manual DMA
            out_specs=pl.BlockSpec((b * n, d), lambda i: (0, 0)),
            scratch_shapes=[pltpu.VMEM((5 * D, 4 * D), jnp.float32),  # weight landing buf
                            pltpu.SemaphoreType.DMA],
        ),
        compiler_params=pltpu.CompilerParams(
            dimension_semantics=("arbitrary",)),
    )(x_flat, idx_col, ea_flat, inv_cnt, masks, vec, w_slab)
    return out.reshape(b, n, d), edge_index, edge_attr


def init_params(key):
    ks = jax.random.split(key, 12)

    def nrm(k, shape, scale=0.1):
        return scale * jax.random.normal(k, shape, jnp.float32)

    return {
        "ln1_g": 1.0 + nrm(ks[0], (1, D), 0.05), "ln1_b": nrm(ks[1], (1, D), 0.05),
        "ln2_g": 1.0 + nrm(ks[2], (1, D), 0.05), "ln2_b": nrm(ks[3], (1, D), 0.05),
        "ln3_g": 1.0 + nrm(ks[4], (1, D), 0.05), "ln3_b": nrm(ks[5], (1, D), 0.05),
        "wq": nrm(ks[6], (D, D)), "bq": nrm(ks[6], (1, D), 0.02),
        "wkv": nrm(ks[7], (D, 2 * D)), "bkv": nrm(ks[7], (1, 2 * D), 0.02),
        "we": nrm(ks[8], (D, D)), "be": nrm(ks[8], (1, D), 0.02),  # edge_bias=True
        "w1": nrm(ks[9], (D, 4 * D)), "b1": nrm(ks[10], (1, 4 * D), 0.02),
        "w2": nrm(ks[11], (4 * D, D)), "b2": jnp.zeros((1, D), jnp.float32),
    }


def reference(p, x_orig, edge_index, edge_attr):
    """Pure-JAX reference reproducing the PyTorch forward semantics."""
    def ln(x, g, b):
        mu = x.mean(-1, keepdims=True)
        var = ((x - mu) ** 2).mean(-1, keepdims=True)
        return (x - mu) / jnp.sqrt(var + EPS) * g + b

    x = ln(x_orig, p["ln1_g"][0], p["ln1_b"][0])
    src, tgt = edge_index[:, 0], edge_index[:, 1]              # (B, E)
    gather = jax.vmap(lambda xi, ii: xi[ii])
    k = gather(x, src)
    q = gather(x, tgt)
    q = q @ p["wq"] + p["bq"][0]
    e = ln(edge_attr, p["ln2_g"][0], p["ln2_b"][0]) @ p["we"] + p["be"][0]
    q = q + e
    kv = k @ p["wkv"] + p["bkv"][0]
    k_join, v_join = kv[..., :D], kv[..., D:]

    def split(t):
        return t.reshape(B, E, H, HEAD).transpose(0, 2, 1, 3)

    qh, kh, vh = split(q), split(k_join), split(v_join)
    w = jnp.einsum("bhed,bhfd->bhef", qh, kh) / (HEAD ** 0.5)
    w = jax.nn.softmax(w, axis=-1)
    a = jnp.einsum("bhef,bhfd->bhed", w, vh).transpose(0, 2, 1, 3).reshape(B, E, D)
    hidden = ln(v_join + a, p["ln3_g"][0], p["ln3_b"][0])
    proj = jnp.maximum(hidden @ p["w1"] + p["b1"][0], 0.0) @ p["w2"] + p["b2"][0]
    hidden = proj + hidden

    def scat(hb, tb):
        sums = jnp.zeros((N, D), jnp.float32).at[tb].add(hb)
        cnt = jnp.zeros((N,), jnp.float32).at[tb].add(1.0)
        return sums / jnp.maximum(cnt, 1.0)[:, None]

    mean = jax.vmap(scat)(hidden, tgt)
    return jnp.where(mean != 0.0, mean, x)


if __name__ == "__main__":
    key = jax.random.PRNGKey(0)
    kx, ke, ki, kp = jax.random.split(key, 4)
    x_orig = jax.random.normal(kx, (B, N, D), jnp.float32)
    edge_attr = jax.random.normal(ke, (B, E, D), jnp.float32)
    edge_index = jax.random.randint(ki, (B, 2, E), 0, N, jnp.int32)
    params = init_params(kp)
    w_slab, vec = pack_params(params)   # one-time parameter packing (init-time in practice)

    x_out, ei, ea = transformer_conv_block(w_slab, vec, x_orig, edge_index, edge_attr)
    x_out = jax.block_until_ready(x_out)

    ref = reference(params, x_orig, edge_index, edge_attr)
    max_err = float(jnp.max(jnp.abs(x_out - ref)))
    assert jnp.allclose(x_out, ref, rtol=2e-4, atol=2e-4), max_err
    print("KERNEL_OK")
</pallas_src>

<mosaic_0001>
module attributes {stable_mosaic.version = 11 : i64} {
  func.func private @main(%arg0: i32) attributes {dimension_semantics = [#tpu.dimension_semantics<core_parallel>], iteration_bounds = array<i64: 2>, tpu.core_type = #tpu.core_type<sc_scalar_subcore>, window_params = []} {
    return
  }
}

module attributes {stable_mosaic.version = 11 : i64} {
  func.func private @main(%arg0: i32) attributes {dimension_semantics = [#tpu.dimension_semantics<core_parallel>], iteration_bounds = array<i64: 2>, tpu.core_type = #tpu.core_type<sc_scalar_subcore>, window_params = []} {
    return
  }
}

module attributes {stable_mosaic.version = 11 : i64} {
  func.func @transformer_conv_kernel(%arg0: i32, %arg1: memref<32x32xf32, #tpu.memory_space<vmem>>, %arg2: memref<32x1xi32, #tpu.memory_space<vmem>>, %arg3: memref<16x32xf32, #tpu.memory_space<vmem>>, %arg4: memref<32x1xf32, #tpu.memory_space<vmem>>, %arg5: memref<144x64xf32, #tpu.memory_space<vmem>>, %arg6: memref<16x128xf32, #tpu.memory_space<vmem>>, %arg7: memref<160x128xf32, #tpu.memory_space<any>>, %arg8: memref<32x32xf32, #tpu.memory_space<vmem>>, %arg9: memref<160x128xf32, #tpu.memory_space<vmem>>, %arg10: memref<!tpu.dma_semaphore, #tpu.memory_space<semaphore_mem>>) attributes {dimension_semantics = [#tpu.dimension_semantics<arbitrary>], iteration_bounds = array<i64: 1>, scalar_prefetch = 0 : i64, scratch_operands = 2 : i64, tpu.core_type = #tpu.core_type<tc>, window_params = [{pipeline_mode = #tpu.pipeline_mode<synchronous>, transform_indices = @transform_0, window_bounds = array<i64: 32, 32>}, {pipeline_mode = #tpu.pipeline_mode<synchronous>, transform_indices = @transform_1, window_bounds = array<i64: 32, 1>}, {pipeline_mode = #tpu.pipeline_mode<synchronous>, transform_indices = @transform_2, window_bounds = array<i64: 16, 32>}, {pipeline_mode = #tpu.pipeline_mode<synchronous>, transform_indices = @transform_3, window_bounds = array<i64: 32, 1>}, {pipeline_mode = #tpu.pipeline_mode<synchronous>, transform_indices = @transform_4, window_bounds = array<i64: 144, 64>}, {pipeline_mode = #tpu.pipeline_mode<synchronous>, transform_indices = @transform_5, window_bounds = array<i64: 16, 128>}, {}, {pipeline_mode = #tpu.pipeline_mode<synchronous>, transform_indices = @transform_7, window_bounds = array<i64: 32, 32>}]} {
    tpu.enqueue_dma source(%arg7 : memref<160x128xf32, #tpu.memory_space<any>>) target(%arg9 : memref<160x128xf32, #tpu.memory_space<vmem>>) target_semaphore(%arg10 : memref<!tpu.dma_semaphore, #tpu.memory_space<semaphore_mem>>)
    %c0 = arith.constant 0 : index
    %c0_0 = arith.constant 0 : index
    %0 = vector.load %arg1[%c0, %c0_0] : memref<32x32xf32, #tpu.memory_space<vmem>>, vector<32x32xf32>
    %c0_1 = arith.constant 0 : index
    %c0_2 = arith.constant 0 : index
    %1 = vector.load %arg3[%c0_1, %c0_2] : memref<16x32xf32, #tpu.memory_space<vmem>>, vector<16x32xf32>
    %c0_3 = arith.constant 0 : index
    %c0_4 = arith.constant 0 : index
    %2 = vector.load %arg2[%c0_3, %c0_4] : memref<32x1xi32, #tpu.memory_space<vmem>>, vector<32x1xi32>
    %c0_5 = arith.constant 0 : index
    %c0_6 = arith.constant 0 : index
    %3 = vector.load %arg6[%c0_5, %c0_6] : memref<16x128xf32, #tpu.memory_space<vmem>>, vector<16x128xf32>
    %c0_7 = arith.constant 0 : index
    %c0_8 = arith.constant 0 : index
    %4 = vector.load %arg5[%c0_7, %c0_8] : memref<144x64xf32, #tpu.memory_space<vmem>>, vector<144x64xf32>
    %5 = vector.extract_strided_slice %3 {offsets = [0, 0], sizes = [1, 32], strides = [1, 1]} : vector<16x128xf32> to vector<1x32xf32>
    %6 = vector.extract_strided_slice %3 {offsets = [1, 0], sizes = [1, 32], strides = [1, 1]} : vector<16x128xf32> to vector<1x32xf32>
    %7 = vector.extract_strided_slice %3 {offsets = [2, 0], sizes = [1, 32], strides = [1, 1]} : vector<16x128xf32> to vector<1x32xf32>
    %8 = vector.extract_strided_slice %3 {offsets = [3, 0], sizes = [1, 32], strides = [1, 1]} : vector<16x128xf32> to vector<1x32xf32>
    %9 = vector.extract_strided_slice %3 {offsets = [4, 0], sizes = [1, 32], strides = [1, 1]} : vector<16x128xf32> to vector<1x32xf32>
    %10 = vector.extract_strided_slice %3 {offsets = [5, 0], sizes = [1, 32], strides = [1, 1]} : vector<16x128xf32> to vector<1x32xf32>
    %11 = vector.extract_strided_slice %3 {offsets = [6, 0], sizes = [1, 128], strides = [1, 1]} : vector<16x128xf32> to vector<1x128xf32>
    %12 = vector.extract_strided_slice %3 {offsets = [7, 0], sizes = [1, 128], strides = [1, 1]} : vector<16x128xf32> to vector<1x128xf32>
    %13 = vector.extract_strided_slice %3 {offsets = [8, 0], sizes = [1, 32], strides = [1, 1]} : vector<16x128xf32> to vector<1x32xf32>
    %14 = vector.extract_strided_slice %4 {offsets = [0, 0], sizes = [64, 64], strides = [1, 1]} : vector<144x64xf32> to vector<64x64xf32>
    %15 = vector.extract_strided_slice %4 {offsets = [64, 0], sizes = [64, 64], strides = [1, 1]} : vector<144x64xf32> to vector<64x64xf32>
    %16 = vector.extract_strided_slice %4 {offsets = [128, 0], sizes = [16, 64], strides = [1, 1]} : vector<144x64xf32> to vector<16x64xf32>
    %cst = arith.constant dense<0.000000e+00> : vector<32xf32>
    %17 = vector.multi_reduction <add>, %0, %cst [1] : vector<32x32xf32> to vector<32xf32>
    %18 = vector.shape_cast %17 : vector<32xf32> to vector<32x1xf32>
    %cst_9 = arith.constant 3.200000e+01 : f32
    %19 = vector.broadcast %cst_9 : f32 to vector<32x1xf32>
    %20 = arith.divf %18, %19 : vector<32x1xf32>
    %21 = vector.broadcast %20 : vector<32x1xf32> to vector<32x32xf32>
    %22 = arith.subf %0, %21 : vector<32x32xf32>
    %23 = arith.mulf %22, %22 : vector<32x32xf32>
    %cst_10 = arith.constant dense<0.000000e+00> : vector<32xf32>
    %24 = vector.multi_reduction <add>, %23, %cst_10 [1] : vector<32x32xf32> to vector<32xf32>
    %25 = vector.shape_cast %24 : vector<32xf32> to vector<32x1xf32>
    %cst_11 = arith.constant 3.200000e+01 : f32
    %26 = vector.broadcast %cst_11 : f32 to vector<32x1xf32>
    %27 = arith.divf %25, %26 : vector<32x1xf32>
    %28 = vector.broadcast %20 : vector<32x1xf32> to vector<32x32xf32>
    %29 = arith.subf %0, %28 : vector<32x32xf32>
    %cst_12 = arith.constant 9.99999974E-6 : f32
    %30 = vector.broadcast %cst_12 : f32 to vector<32x1xf32>
    %31 = arith.addf %27, %30 : vector<32x1xf32>
    %32 = math.rsqrt %31 : vector<32x1xf32>
    %33 = vector.broadcast %32 : vector<32x1xf32> to vector<32x32xf32>
    %34 = arith.mulf %29, %33 : vector<32x32xf32>
    %35 = vector.broadcast %5 : vector<1x32xf32> to vector<32x32xf32>
    %36 = arith.mulf %34, %35 : vector<32x32xf32>
    %37 = vector.broadcast %6 : vector<1x32xf32> to vector<32x32xf32>
    %38 = arith.addf %36, %37 : vector<32x32xf32>
    %cst_13 = arith.constant dense<0.000000e+00> : vector<16xf32>
    %39 = vector.multi_reduction <add>, %1, %cst_13 [1] : vector<16x32xf32> to vector<16xf32>
    %40 = vector.shape_cast %39 : vector<16xf32> to vector<16x1xf32>
    %cst_14 = arith.constant 3.200000e+01 : f32
    %41 = vector.broadcast %cst_14 : f32 to vector<16x1xf32>
    %42 = arith.divf %40, %41 : vector<16x1xf32>
    %43 = vector.broadcast %42 : vector<16x1xf32> to vector<16x32xf32>
    %44 = arith.subf %1, %43 : vector<16x32xf32>
    %45 = arith.mulf %44, %44 : vector<16x32xf32>
    %cst_15 = arith.constant dense<0.000000e+00> : vector<16xf32>
    %46 = vector.multi_reduction <add>, %45, %cst_15 [1] : vector<16x32xf32> to vector<16xf32>
    %47 = vector.shape_cast %46 : vector<16xf32> to vector<16x1xf32>
    %cst_16 = arith.constant 3.200000e+01 : f32
    %48 = vector.broadcast %cst_16 : f32 to vector<16x1xf32>
    %49 = arith.divf %47, %48 : vector<16x1xf32>
    %50 = vector.broadcast %42 : vector<16x1xf32> to vector<16x32xf32>
    %51 = arith.subf %1, %50 : vector<16x32xf32>
    %cst_17 = arith.constant 9.99999974E-6 : f32
    %52 = vector.broadcast %cst_17 : f32 to vector<16x1xf32>
    %53 = arith.addf %49, %52 : vector<16x1xf32>
    %54 = math.rsqrt %53 : vector<16x1xf32>
    %55 = vector.broadcast %54 : vector<16x1xf32> to vector<16x32xf32>
    %56 = arith.mulf %51, %55 : vector<16x32xf32>
    %57 = vector.broadcast %7 : vector<1x32xf32> to vector<16x32xf32>
    %58 = arith.mulf %56, %57 : vector<16x32xf32>
    %59 = vector.broadcast %8 : vector<1x32xf32> to vector<16x32xf32>
    %60 = arith.addf %58, %59 : vector<16x32xf32>
    %61 = tpu.iota {dimensions = array<i32: 1>} : vector<32x32xi32>
    %62 = vector.broadcast %2 : vector<32x1xi32> to vector<32x32xi32>
    %63 = arith.cmpi eq, %61, %62 : vector<32x32xi32>
    %64 = arith.extui %63 : vector<32x32xi1> to vector<32x32xi32>
    %65 = arith.sitofp %64 : vector<32x32xi32> to vector<32x32xf32>
    %cst_18 = arith.constant dense<0.000000e+00> : vector<32x32xf32>
    %66 = tpu.matmul %65, %38, %cst_18 {dimension_numbers = #tpu.dot_dimension_numbers<[1], [0], [0], [1], [0, 0, 1, 1], [], []>} : vector<32x32xf32>, vector<32x32xf32>, vector<32x32xf32> -> vector<32x32xf32>
    %67 = vector.extract_strided_slice %66 {offsets = [0, 0], sizes = [16, 32], strides = [1, 1]} : vector<32x32xf32> to vector<16x32xf32>
    %68 = vector.extract_strided_slice %66 {offsets = [16, 0], sizes = [16, 32], strides = [1, 1]} : vector<32x32xf32> to vector<16x32xf32>
    %69 = vector.extract_strided_slice %65 {offsets = [0, 0], sizes = [16, 32], strides = [1, 1]} : vector<32x32xf32> to vector<16x32xf32>
    %70 = tpu.concatenate %67, %60, %68 in 1 : vector<16x32xf32>, vector<16x32xf32>, vector<16x32xf32> -> vector<16x96xf32>
    tpu.wait_dma2 semaphore(%arg10 : memref<!tpu.dma_semaphore, #tpu.memory_space<semaphore_mem>>) src(%arg7 : memref<160x128xf32, #tpu.memory_space<any>>) dst(%arg9 : memref<160x128xf32, #tpu.memory_space<vmem>>)
    %c0_19 = arith.constant 0 : index
    %c0_20 = arith.constant 0 : index
    %71 = vector.load %arg9[%c0_19, %c0_20] : memref<160x128xf32, #tpu.memory_space<vmem>>, vector<96x128xf32>
    %c96 = arith.constant 96 : index
    %c0_21 = arith.constant 0 : index
    %72 = vector.load %arg9[%c96, %c0_21] : memref<160x128xf32, #tpu.memory_space<vmem>>, vector<32x128xf32>
    %c128 = arith.constant 128 : index
    %c0_22 = arith.constant 0 : index
    %73 = vector.load %arg9[%c128, %c0_22] : memref<160x128xf32, #tpu.memory_space<vmem>>, vector<32x128xf32>
    %cst_23 = arith.constant dense<0.000000e+00> : vector<16x128xf32>
    %74 = tpu.matmul %70, %71, %cst_23 {dimension_numbers = #tpu.dot_dimension_numbers<[1], [0], [0], [1], [0, 0, 1, 1], [], []>} : vector<16x96xf32>, vector<96x128xf32>, vector<16x128xf32> -> vector<16x128xf32>
    %75 = vector.broadcast %11 : vector<1x128xf32> to vector<16x128xf32>
    %76 = arith.addf %74, %75 : vector<16x128xf32>
    %77 = vector.extract_strided_slice %76 {offsets = [0, 0], sizes = [16, 32], strides = [1, 1]} : vector<16x128xf32> to vector<16x32xf32>
    %78 = vector.extract_strided_slice %76 {offsets = [0, 32], sizes = [16, 64], strides = [1, 1]} : vector<16x128xf32> to vector<16x64xf32>
    %79 = vector.extract_strided_slice %76 {offsets = [0, 64], sizes = [16, 32], strides = [1, 1]} : vector<16x128xf32> to vector<16x32xf32>
    %80 = tpu.concatenate %78, %78, %78, %78 in 0 : vector<16x64xf32>, vector<16x64xf32>, vector<16x64xf32>, vector<16x64xf32> -> vector<64x64xf32>
    %81 = arith.mulf %80, %14 : vector<64x64xf32>
    %82 = vector.extract_strided_slice %81 {offsets = [0, 0], sizes = [64, 32], strides = [1, 1]} : vector<64x64xf32> to vector<64x32xf32>
    %83 = vector.extract_strided_slice %81 {offsets = [0, 32], sizes = [64, 32], strides = [1, 1]} : vector<64x64xf32> to vector<64x32xf32>
    %cst_24 = arith.constant dense<0.000000e+00> : vector<16x64xf32>
    %84 = tpu.matmul %77, %82, %cst_24 {dimension_numbers = #tpu.dot_dimension_numbers<[1], [1], [0], [0], [0, 0, 1, 0], [], []>} : vector<16x32xf32>, vector<64x32xf32>, vector<16x64xf32> -> vector<16x64xf32>
    %cst_25 = arith.constant 0.353553385 : f32
    %85 = vector.broadcast %cst_25 : f32 to vector<16x64xf32>
    %86 = arith.mulf %84, %85 : vector<16x64xf32>
    %87 = arith.addf %86, %16 : vector<16x64xf32>
    %cst_26 = arith.constant dense<0xFF800000> : vector<16xf32>
    %88 = vector.multi_reduction <maximumf>, %87, %cst_26 [1] : vector<16x64xf32> to vector<16xf32>
    %89 = vector.shape_cast %88 : vector<16xf32> to vector<16x1xf32>
    %90 = vector.broadcast %89 : vector<16x1xf32> to vector<16x64xf32>
    %91 = arith.subf %87, %90 : vector<16x64xf32>
    %92 = math.exp %91 : vector<16x64xf32>
    %cst_27 = arith.constant dense<0.000000e+00> : vector<16x64xf32>
    %93 = tpu.matmul %92, %15, %cst_27 {dimension_numbers = #tpu.dot_dimension_numbers<[1], [0], [0], [1], [0, 0, 1, 1], [], []>} : vector<16x64xf32>, vector<64x64xf32>, vector<16x64xf32> -> vector<16x64xf32>
    %cst_28 = arith.constant 1.000000e-30 : f32
    %94 = vector.broadcast %cst_28 : f32 to vector<16x64xf32>
    %95 = arith.maximumf %93, %94 : vector<16x64xf32>
    %96 = tpu.reciprocal %95 {approx = true} : vector<16x64xf32> -> vector<16x64xf32>
    %97 = arith.mulf %95, %96 : vector<16x64xf32>
    %cst_29 = arith.constant 2.000000e+00 : f32
    %98 = vector.broadcast %cst_29 : f32 to vector<16x64xf32>
    %99 = arith.subf %98, %97 : vector<16x64xf32>
    %100 = arith.mulf %96, %99 : vector<16x64xf32>
    %101 = arith.mulf %95, %100 : vector<16x64xf32>
    %cst_30 = arith.constant 2.000000e+00 : f32
    %102 = vector.broadcast %cst_30 : f32 to vector<16x64xf32>
    %103 = arith.subf %102, %101 : vector<16x64xf32>
    %104 = arith.mulf %100, %103 : vector<16x64xf32>
    %105 = arith.mulf %92, %104 : vector<16x64xf32>
    %cst_31 = arith.constant dense<0.000000e+00> : vector<16x32xf32>
    %106 = tpu.matmul %105, %83, %cst_31 {dimension_numbers = #tpu.dot_dimension_numbers<[1], [0], [0], [1], [0, 0, 1, 1], [], []>} : vector<16x64xf32>, vector<64x32xf32>, vector<16x32xf32> -> vector<16x32xf32>
    %107 = arith.addf %79, %106 : vector<16x32xf32>
    %cst_32 = arith.constant dense<0.000000e+00> : vector<16xf32>
    %108 = vector.multi_reduction <add>, %107, %cst_32 [1] : vector<16x32xf32> to vector<16xf32>
    %109 = vector.shape_cast %108 : vector<16xf32> to vector<16x1xf32>
    %cst_33 = arith.constant 3.200000e+01 : f32
    %110 = vector.broadcast %cst_33 : f32 to vector<16x1xf32>
    %111 = arith.divf %109, %110 : vector<16x1xf32>
    %112 = vector.broadcast %111 : vector<16x1xf32> to vector<16x32xf32>
    %113 = arith.subf %107, %112 : vector<16x32xf32>
    %114 = arith.mulf %113, %113 : vector<16x32xf32>
    %cst_34 = arith.constant dense<0.000000e+00> : vector<16xf32>
    %115 = vector.multi_reduction <add>, %114, %cst_34 [1] : vector<16x32xf32> to vector<16xf32>
    %116 = vector.shape_cast %115 : vector<16xf32> to vector<16x1xf32>
    %cst_35 = arith.constant 3.200000e+01 : f32
    %117 = vector.broadcast %cst_35 : f32 to vector<16x1xf32>
    %118 = arith.divf %116, %117 : vector<16x1xf32>
    %119 = vector.broadcast %111 : vector<16x1xf32> to vector<16x32xf32>
    %120 = arith.subf %107, %119 : vector<16x32xf32>
    %cst_36 = arith.constant 9.99999974E-6 : f32
    %121 = vector.broadcast %cst_36 : f32 to vector<16x1xf32>
    %122 = arith.addf %118, %121 : vector<16x1xf32>
    %123 = math.rsqrt %122 : vector<16x1xf32>
    %124 = vector.broadcast %123 : vector<16x1xf32> to vector<16x32xf32>
    %125 = arith.mulf %120, %124 : vector<16x32xf32>
    %126 = vector.broadcast %9 : vector<1x32xf32> to vector<16x32xf32>
    %127 = arith.mulf %125, %126 : vector<16x32xf32>
    %128 = vector.broadcast %10 : vector<1x32xf32> to vector<16x32xf32>
    %129 = arith.addf %127, %128 : vector<16x32xf32>
    %cst_37 = arith.constant dense<0.000000e+00> : vector<16x128xf32>
    %130 = tpu.matmul %129, %72, %cst_37 {dimension_numbers = #tpu.dot_dimension_numbers<[1], [0], [0], [1], [0, 0, 1, 1], [], []>} : vector<16x32xf32>, vector<32x128xf32>, vector<16x128xf32> -> vector<16x128xf32>
    %131 = vector.broadcast %12 : vector<1x128xf32> to vector<16x128xf32>
    %132 = arith.addf %130, %131 : vector<16x128xf32>
    %cst_38 = arith.constant 0.000000e+00 : f32
    %133 = vector.broadcast %cst_38 : f32 to vector<16x128xf32>
    %134 = arith.maximumf %132, %133 : vector<16x128xf32>
    %cst_39 = arith.constant dense<0.000000e+00> : vector<16x32xf32>
    %135 = tpu.matmul %134, %73, %cst_39 {dimension_numbers = #tpu.dot_dimension_numbers<[1], [1], [0], [0], [0, 0, 1, 0], [], []>} : vector<16x128xf32>, vector<32x128xf32>, vector<16x32xf32> -> vector<16x32xf32>
    %136 = vector.broadcast %13 : vector<1x32xf32> to vector<16x32xf32>
    %137 = arith.addf %135, %136 : vector<16x32xf32>
    %138 = arith.addf %137, %129 : vector<16x32xf32>
    %cst_40 = arith.constant dense<0.000000e+00> : vector<32x32xf32>
    %139 = tpu.matmul %69, %138, %cst_40 {dimension_numbers = #tpu.dot_dimension_numbers<[0], [0], [1], [1], [0, 1, 1, 1], [], []>} : vector<16x32xf32>, vector<16x32xf32>, vector<32x32xf32> -> vector<32x32xf32>
    %c0_41 = arith.constant 0 : index
    %c0_42 = arith.constant 0 : index
    %140 = vector.load %arg4[%c0_41, %c0_42] : memref<32x1xf32, #tpu.memory_space<vmem>>, vector<32x1xf32>
    %141 = vector.broadcast %140 : vector<32x1xf32> to vector<32x32xf32>
    %142 = arith.mulf %139, %141 : vector<32x32xf32>
    %cst_43 = arith.constant 0.000000e+00 : f32
    %143 = vector.broadcast %cst_43 : f32 to vector<32x32xf32>
    %144 = arith.cmpf one, %142, %143 : vector<32x32xf32>
    %145 = arith.select %144, %142, %38 : vector<32x32xi1>, vector<32x32xf32>
    %c0_44 = arith.constant 0 : index
    %c0_45 = arith.constant 0 : index
    %146 = vector.load %arg8[%c0_44, %c0_45] : memref<32x32xf32, #tpu.memory_space<vmem>>, vector<32x32xf32>
    tpu.vector_store %arg8[%c0_44, %c0_45], %145 {strides = array<i32>} : memref<32x32xf32, #tpu.memory_space<vmem>>, vector<32x32xf32>,
    return
  }
  func.func @transform_0(%arg0: i32) -> (i32, i32) {
    %c0_i32 = arith.constant 0 : i32
    %c0_i32_0 = arith.constant 0 : i32
    %c0_i32_1 = arith.constant 0 : i32
    return %c0_i32, %c0_i32_0 : i32, i32
  }
  func.func @transform_1(%arg0: i32) -> (i32, i32) {
    %c0_i32 = arith.constant 0 : i32
    %c0_i32_0 = arith.constant 0 : i32
    %c0_i32_1 = arith.constant 0 : i32
    return %c0_i32, %c0_i32_0 : i32, i32
  }
  func.func @transform_2(%arg0: i32) -> (i32, i32) {
    %c0_i32 = arith.constant 0 : i32
    %c0_i32_0 = arith.constant 0 : i32
    %c0_i32_1 = arith.constant 0 : i32
    return %c0_i32, %c0_i32_0 : i32, i32
  }
  func.func @transform_3(%arg0: i32) -> (i32, i32) {
    %c0_i32 = arith.constant 0 : i32
    %c0_i32_0 = arith.constant 0 : i32
    %c0_i32_1 = arith.constant 0 : i32
    return %c0_i32, %c0_i32_0 : i32, i32
  }
  func.func @transform_4(%arg0: i32) -> (i32, i32) {
    %c0_i32 = arith.constant 0 : i32
    %c0_i32_0 = arith.constant 0 : i32
    %c0_i32_1 = arith.constant 0 : i32
    return %c0_i32, %c0_i32_0 : i32, i32
  }
  func.func @transform_5(%arg0: i32) -> (i32, i32) {
    %c0_i32 = arith.constant 0 : i32
    %c0_i32_0 = arith.constant 0 : i32
    %c0_i32_1 = arith.constant 0 : i32
    return %c0_i32, %c0_i32_0 : i32, i32
  }
  func.func @transform_7(%arg0: i32) -> (i32, i32) {
    %c0_i32 = arith.constant 0 : i32
    %c0_i32_0 = arith.constant 0 : i32
    %c0_i32_1 = arith.constant 0 : i32
    return %c0_i32, %c0_i32_0 : i32, i32
  }
}

</mosaic_0001>

<bundles_post_ra>
// kernel: transformer_conv_block.1
= control target key start
LH: loop header
LB: loop body
LE: loop exit
PB: predicated region body
PF: predicated region fallthrough
CT: control target
= control target key end

     0   :  { %12 = vsyncpa [#allocation5], 0  ;;  %vm135_vm0 = vcmask 261120   ;;  %s2291_s0 = inlined_call_operand.vmem [shape: f32[32,32], index: 0, kind: input, shape index: {}]   ;;  %s2292_s1 = inlined_call_operand.vmem [shape: s32[32,1], index: 1, kind: input, shape index: {}]   ;;  %s2293_s2 = inlined_call_operand.vmem [shape: f32[16,32], index: 2, kind: input, shape index: {}]   ;;  %s2294_s3 = inlined_call_operand.vmem [shape: f32[32,1], index: 3, kind: input, shape index: {}]   ;;  %s2295_s4 = inlined_call_operand.vmem [shape: f32[144,64], index: 4, kind: input, shape index: {}]   ;;  %s2296_s5 = inlined_call_operand.vmem [shape: f32[16,128], index: 5, kind: input, shape index: {}]   ;;  %s2297_s6 = inlined_call_operand.vmem [shape: f32[160,128], index: 6, kind: input, shape index: {}]   ;;  %s2298_s7 = inlined_call_operand.hbm [shape: f32[32,32], index: 7, kind: output, shape index: {}]  }
   0x1   :  { %v1815_v0 = vld [vmem:[%s2297_s6] sm:$0xff]  ;;  %v1820_v1 = vld [vmem:[%s2297_s6 + $0x8] sm:$0xff]  ;;  %v1825_v2 = vld [vmem:[%s2297_s6 + $0x10] sm:$0xff] }
   0x2   :  { %v1830_v3 = vld [vmem:[%s2297_s6 + $0x18] sm:$0xff]  ;;  %v1835_v4 = vld [vmem:[%s2297_s6 + $0x20] sm:$0xff]  ;;  %v1840_v5 = vld [vmem:[%s2297_s6 + $0x28] sm:$0xff] }
   0x3   :  { %v1845_v6 = vld [vmem:[%s2297_s6 + $0x30] sm:$0xff]  ;;  %v1850_v7 = vld [vmem:[%s2297_s6 + $0x38] sm:$0xff]  ;;  %v1855_v8 = vld [vmem:[%s2297_s6 + $0x40] sm:$0xff] }
   0x4   :  { %v1860_v9 = vld [vmem:[%s2297_s6 + $0x48] sm:$0xff]  ;;  %v1865_v10 = vld [vmem:[%s2297_s6 + $0x50] sm:$0xff]  ;;  %v1870_v11 = vld [vmem:[%s2297_s6 + $0x58] sm:$0xff] }
   0x5   :  { %v1875_v12 = vld [vmem:[%s2297_s6 + $0x60] sm:$0xff]  ;;  %v1880_v13 = vld [vmem:[%s2297_s6 + $0x68] sm:$0xff]  ;;  %v1885_v14 = vld [vmem:[%s2297_s6 + $0x70] sm:$0xff] }
   0x6   :  { %v1890_v15 = vld [vmem:[%s2297_s6 + $0x78] sm:$0xff]  ;;  %v1895_v16 = vld [vmem:[%s2297_s6 + $0x80] sm:$0xff]  ;;  %v1900_v17 = vld [vmem:[%s2297_s6 + $0x88] sm:$0xff] }
   0x7   :  { %v1905_v18 = vld [vmem:[%s2297_s6 + $0x90] sm:$0xff]  ;;  %v1910_v19 = vld [vmem:[%s2297_s6 + $0x98] sm:$0xff]  ;;  %v105_v20 = vld [vmem:[%s2291_s0] sm:$0xff] }
   0x8   :  { %2305 = vst [vmem:[#allocation9_spill] sm:$0xff] %v1905_v18  ;;  %2306 = vst [vmem:[#allocation10_spill] sm:$0xff] %v1910_v19  ;;  %v107_v21 = vld [vmem:[%s2291_s0 + $0x10] sm:$0xff]  ;;  %v106_v22 = vld [vmem:[%s2291_s0 + $0x8] sm:$0xff]  ;;  %v136_v23 = vsel %vm135_vm0, %v105_v20, 0.0 }
   0x9   :  { %v142_v24 = vsel %vm135_vm0, %v107_v21, 0.0  ;;  %v108_v25 = vld [vmem:[%s2291_s0 + $0x18] sm:$0xff] }
   0xa   :  { %104 = vsyncadd [#allocation3], 2560  ;;  %137 = vadd.xlane.f32.xlu0 %v136_v23  ;;  %143 = vadd.xlane.f32.xlu1 %v142_v24  ;;  %v139_v26 = vsel %vm135_vm0, %v106_v22, 0.0  ;;  %v145_v27 = vsel %vm135_vm0, %v108_v25, 0.0  ;;  %v2299_v28 = vmov 0   ;;  %v112_v44 = vld [vmem:[%s2292_s1 + $0x8] sm:$0xff] }
   0xb   :  { %1671 = vset.pattern.permute.xlu1 %v2299_v28  ;;  %1670 = vset.pattern.permute.xlu0 %v2299_v28  ;;  %v113_v45 = vld [vmem:[%s2292_s1 + $0x10] sm:$0xff]  ;;  %v111_v46 = vld [vmem:[%s2292_s1] sm:$0xff]  ;;  %v1957_v47 = vld [vmem:[%s2296_s5 + $0x8] sm:$0xff]  ;;  %s1767_s6 = smov 64   ;;  %vm384_vm5 = vcmask 523264  }
   0xc   :  { %2307 = vst [vmem:[#allocation11_spill] sm:$0xff] %v1957_v47  ;;  %v1962_v48 = vld [vmem:[%s2295_s4] sm:$0xff]  ;;  %v1967_v49 = vld [vmem:[%s2295_s4 + $0x8] sm:$0xff]  ;;  %v1972_v50 = vld [vmem:[%s2295_s4 + $0x10] sm:$0xff] }
   0xd   :  { %v1977_v51 = vld [vmem:[%s2295_s4 + $0x18] sm:$0xff]  ;;  %v1982_v52 = vld [vmem:[%s2295_s4 + $0x20] sm:$0xff]  ;;  %v1987_v53 = vld [vmem:[%s2295_s4 + $0x28] sm:$0xff] }
   0xe   :  { %140 = vadd.xlane.f32.xlu0 %v139_v26  ;;  %146 = vadd.xlane.f32.xlu1 %v145_v27  ;;  %v1992_v54 = vld [vmem:[%s2295_s4 + $0x30] sm:$0xff]  ;;  %v1997_v55 = vld [vmem:[%s2295_s4 + $0x38] sm:$0xff]  ;;  %v2002_v56 = vld [vmem:[%s2295_s4 + $0x40] sm:$0xff] }
   0xf   :  { %v2007_v57 = vld [vmem:[%s2295_s4 + $0x48] sm:$0xff]  ;;  %v2012_v58 = vld [vmem:[%s2295_s4 + $0x50] sm:$0xff]  ;;  %v2017_v59 = vld [vmem:[%s2295_s4 + $0x58] sm:$0xff] }
  0x10   :  { %v2022_v60 = vld [vmem:[%s2295_s4 + $0x60] sm:$0xff]  ;;  %v2027_v61 = vld [vmem:[%s2295_s4 + $0x68] sm:$0xff]  ;;  %v2032_v62 = vld [vmem:[%s2295_s4 + $0x70] sm:$0xff] }
  0x11   :  { %v2037_v63 = vld [vmem:[%s2295_s4 + $0x78] sm:$0xff]  ;;  %v2054_v26 = vld [vmem:[%s2293_s2 + $0x8] sm:$0xff] }
  0x97   :  { %v138_v29 = vpop.xlane.xlu0 %137  ;;  %v144_v30 = vpop.xlane.xlu1 %143 }
  0x98   :  { %v149_v31 = vmul.f32 0.03125, %v138_v29  ;;  %v151_v32 = vmul.f32 0.03125, %v144_v30  ;;  %v208_v29 = vsel %vm135_vm0, %v2054_v26, 0.0 }
  0x9a   :  { %v1930_v33 = vsub.f32 %v105_v20, %v149_v31  ;;  %v1932_v34 = vsub.f32 %v107_v21, %v151_v32  ;;  %v2042_v20 = vld [vmem:[%s2295_s4 + $0x80] sm:$0xff]  ;;  %v2047_v21 = vld [vmem:[%s2295_s4 + $0x88] sm:$0xff] }
  0x9b   :  { %v141_v35 = vpop.xlane.xlu0 %140  ;;  %v2067_v31 = vld [vmem:[%s2293_s2] sm:$0xff] }
  0x9c   :  { %v150_v36 = vmul.f32 0.03125, %v141_v35  ;;  %v157_v37 = vmul.f32 %v1930_v33, %v1930_v33  ;;  %v159_v38 = vmul.f32 %v1932_v34, %v1932_v34  ;;  %v205_v32 = vsel %vm135_vm0, %v2067_v31, 0.0 }
  0x9e   :  { %v1938_v39 = vsub.f32 %v106_v22, %v150_v36  ;;  %v161_v40 = vsel %vm135_vm0, %v157_v37, 0.0  ;;  %v167_v41 = vsel %vm135_vm0, %v159_v38, 0.0  ;;  %v147_v22 = vpop.xlane.xlu1 %146  ;;  %v189_v37 = vlaneseq }
  0x9f   :  { %162 = vadd.xlane.f32.xlu0 %v161_v40  ;;  %v152_v23 = vmul.f32 0.03125, %v147_v22  ;;  %v1765_v22 = vmov 0.0  }
  0xa0   :  { %v158_v42 = vmul.f32 %v1938_v39, %v1938_v39 }
  0xa1   :  { %v2049_v24 = vsub.f32 %v108_v25, %v152_v23  ;;  %v114_v25 = vld [vmem:[%s2292_s1 + $0x18] sm:$0xff] }
  0xa2   :  { %v164_v43 = vsel %vm135_vm0, %v158_v42, 0.0  ;;  %v244_v42 = vand.u32 127, %v189_v37 }
  0xa3   :  { %168 = vadd.xlane.f32.xlu0 %v167_v41  ;;  %165 = vadd.xlane.f32.xlu1 %v164_v43  ;;  %v160_v27 = vmul.f32 %v2049_v24, %v2049_v24 }
  0xa5   :  { %v170_v30 = vsel %vm135_vm0, %v160_v27, 0.0 }
  0xb4   :  { %249 = vperm.xlu1 %1671, %v112_v44  }
  0xb8   :  { %252 = vperm.xlu1 %1671, %v113_v45   ;;  %v2071_v45 = vshrl.u32 %v189_v37, 7 }
  0xb9   :  { %246 = vperm.xlu0 %1670, %v111_v46  }
  0xd8   :  { %209 = vadd.xlane.f32.xlu0 %v208_v29  ;;  %v2301_v29 = vsub.s32 0, %v2071_v45 }
  0xdc   :  { %171 = vadd.xlane.f32.xlu1 %v170_v30 }
  0xed   :  { %255 = vperm.xlu1 %1671, %v114_v25   ;;  %v2079_v25 = vld [vmem:[%s2296_s5] sm:$0xff]  ;;  %s1766_s5 = smov 32  }
 0x111   :  { %206 = vadd.xlane.f32.xlu1 %v205_v32 }
 0x12c   :  { %v163_v35 = vpop.xlane.xlu0 %162 }
 0x12d   :  { %v173_v36 = vmul.f32 0.03125, %v163_v35 }
 0x12f   :  { %v177_v38 = vadd.f32 1e-05, %v173_v36 }
 0x130   :  { %v166_v40 = vpop.xlane.xlu1 %165  ;;  %v169_v44 = vpop.xlane.xlu0 %168 }
 0x131   :  { %1672 = vrsqrt.f32 %v177_v38  ;;  %v174_v41 = vmul.f32 0.03125, %v166_v40  ;;  %v192_v38 = vrot.slane %v2079_v25, %v2301_v29  ;;  %v199_v40 = vsub.s32 1, %v2071_v45 }
 0x133   :  { %v178_v43 = vadd.f32 1e-05, %v174_v41 }
 0x134   :  { %v250_v46 = vpop.permute.xlu1 %249 }
 0x135   :  { %1674 = vrsqrt.f32 %v178_v43  ;;  %vm258_vm1 = vcmp.eq.s32.totalorder %v244_v42, %v250_v46 }
 0x136   :  { %v2073_v23 = vsel %vm258_vm1, 1.0, %v1765_v22 }
 0x138   :  { %v253_v27 = vpop.permute.xlu1 %252  ;;  %v247_v30 = vpop.permute.xlu0 %246 }
 0x139   :  { %vm259_vm2 = vcmp.eq.s32.totalorder %v244_v42, %v253_v27  ;;  %vm257_vm3 = vcmp.eq.s32.totalorder %v244_v42, %v247_v30  ;;  %v200_v27 = vrot.slane %v2079_v25, %v199_v40 }
 0x13a   :  { %v1325_v32 = vsel %vm259_vm2, 1.0, %v1765_v22  ;;  %v2081_v35 = vsel %vm257_vm3, 1.0, %v1765_v22 }
 0x13b   :  { %2308 = vst [vmem:[#allocation12_spill] sm:$0xff] %v2081_v35  ;;  %v1673_v36 = vpop.eup %1672  ;;  %1432 = vmatprep.mubr.msk.f32.mxu0 %vm135_vm0, %v2081_v35 }
 0x13c   :  { %v185_v37 = vmul.f32 %v1673_v36, %v1930_v33  ;;  %v175_v36 = vmul.f32 0.03125, %v169_v44 }
 0x13e   :  { %v193_v46 = vmul.f32 %v192_v38, %v185_v37  ;;  %v179_v29 = vadd.f32 1e-05, %v175_v36 }
 0x13f   :  { %v1675_v41 = vpop.eup %1674 }
 0x140   :  { %v186_v43 = vmul.f32 %v1675_v41, %v1938_v39  ;;  %v2092_v28 = vadd.f32 %v200_v27, %v193_v46  ;;  %1676 = vrsqrt.f32 %v179_v29 }
 0x142   :  { %v194_v30 = vmul.f32 %v192_v38, %v186_v43  ;;  %2309 = vst [vmem:[#allocation13_spill] sm:$0xff] %v2092_v28 }
 0x144   :  { %v2094_v47 = vadd.f32 %v200_v27, %v194_v30 }
 0x146   :  { %2310 = vst [vmem:[#allocation14_spill] sm:$0xff] %v2094_v47  ;;  %v1554_v33 = vpack.c.bf16 %v2094_v47, %v2092_v28 }
 0x148   :  { %1555 = vmatprep.subr.bf16.mxu0 %v1554_v33 }
 0x149   :  { %1557 = vmatpush3.bf16.msra.mxu0 %v1554_v33 }
 0x14a   :  { %v1677_v40 = vpop.eup %1676 }
 0x14b   :  { %v187_v41 = vmul.f32 %v1677_v40, %v1932_v34 }
 0x14d   :  { %v195_v30 = vmul.f32 %v192_v38, %v187_v41 }
 0x14f   :  { %v2100_v47 = vadd.f32 %v200_v27, %v195_v30 }
 0x169   :  { %v172_v19 = vpop.xlane.xlu1 %171 }
 0x16a   :  { %v176_v18 = vmul.f32 0.03125, %v172_v19 }
 0x16c   :  { %v180_v35 = vadd.f32 1e-05, %v176_v18  ;;  %v210_v18 = vpop.xlane.xlu0 %209 }
 0x16d   :  { %v256_v39 = vpop.permute.xlu1 %255  ;;  %v212_v34 = vmul.f32 0.03125, %v210_v18 }
 0x16e   :  { %1678 = vrsqrt.f32 %v180_v35  ;;  %vm260_vm4 = vcmp.eq.s32.totalorder %v244_v42, %v256_v39 }
 0x16f   :  { %v1326_v37 = vsel %vm260_vm4, 1.0, %v1765_v22  ;;  %v214_v22 = vsub.f32 %v2054_v26, %v212_v34  ;;  %v233_v26 = vsub.s32 2, %v2071_v45 }
 0x171   :  { %v216_v35 = vmul.f32 %v214_v22, %v214_v22  ;;  %v234_v41 = vrot.slane %v2079_v25, %v233_v26 }
 0x178   :  { %v1679_v43 = vpop.eup %1678 }
 0x179   :  { %v188_v46 = vmul.f32 %v1679_v43, %v2049_v24 }
 0x17b   :  { %v196_v28 = vmul.f32 %v192_v38, %v188_v46 }
 0x17d   :  { %v2102_v44 = vadd.f32 %v200_v27, %v196_v28  ;;  %v220_v27 = vsel %vm135_vm0, %v216_v35, 0.0 }
 0x17f   :  { %v1558_v19 = vpack.c.bf16 %v2102_v44, %v2100_v47 }
 0x181   :  { %1559 = vmatprep.subr.bf16.mxu0 %v1558_v19 }
 0x182   :  { %1561 = vmatpush3.bf16.msra.mxu0 %v1558_v19 }
 0x185   :  { %1433 = vmatmul.mubr.msk.f32.vlgmr.msra.gmra.mrb[0].mxu0 %vm135_vm0, %v2073_v23 }
 0x186   :  { %1435 = vmatprep.mubr.msk.f32.mxu0 %vm135_vm0, %v1325_v32 }
 0x189   :  { %1436 = vmatmul.mubr.msk.f32.gmra.mrb[2].mxu0 %vm135_vm0, %v1326_v37 }
 0x19e   :  { %v207_v24 = vpop.xlane.xlu1 %206 }
 0x19f   :  { %v211_v42 = vmul.f32 0.03125, %v207_v24 }
 0x1a1   :  { %v213_v28 = vsub.f32 %v2067_v31, %v211_v42  ;;  %v239_v31 = vsub.s32 3, %v2071_v45 }
 0x1a3   :  { %v215_v29 = vmul.f32 %v213_v28, %v213_v28  ;;  %v240_v30 = vrot.slane %v2079_v25, %v239_v31  ;;  %v1562_v31 = vpack.c.bf16 %v1820_v1, %v1815_v0 }
 0x1a5   :  { %v217_v38 = vsel %vm135_vm0, %v215_v29, 0.0 }
 0x1a6   :  { %218 = vadd.xlane.f32.xlu1 %v217_v38 }
 0x1aa   :  { %221 = vadd.xlane.f32.xlu1 %v220_v27 }
 0x233   :  { %v219_v33 = vpop.xlane.xlu1 %218 }
 0x234   :  { %v223_v32 = vmul.f32 0.03125, %v219_v33 }
 0x236   :  { %v225_v36 = vadd.f32 1e-05, %v223_v32 }
 0x237   :  { %v222_v39 = vpop.xlane.xlu1 %221 }
 0x238   :  { %1680 = vrsqrt.f32 %v225_v36  ;;  %v224_v37 = vmul.f32 0.03125, %v222_v39 }
 0x23a   :  { %v226_v40 = vadd.f32 1e-05, %v224_v37 }
 0x23c   :  { %1682 = vrsqrt.f32 %v226_v40 }
 0x242   :  { %v1681_v43 = vpop.eup %1680 }
 0x243   :  { %v229_v46 = vmul.f32 %v1681_v43, %v213_v28 }
 0x245   :  { %v235_v19 = vmul.f32 %v234_v41, %v229_v46 }
 0x246   :  { %v1683_v18 = vpop.eup %1682 }
 0x247   :  { %v241_v34 = vadd.f32 %v240_v30, %v235_v19  ;;  %v230_v24 = vmul.f32 %v1683_v18, %v214_v22 }
 0x249   :  { %368 = vrot.lane.b32.xlu1 %v241_v34, %s1766_s5  ;;  %v236_v42 = vmul.f32 %v234_v41, %v230_v24  ;;  %v1566_v41 = vpack.c.bf16 %v1830_v3, %v1825_v2 }
 0x24b   :  { %v242_v29 = vadd.f32 %v240_v30, %v236_v42 }
 0x24d   :  { %370 = vrot.lane.b32.xlu0 %v242_v29, %s1766_s5 }
 0x258   :  { %v1434_v35 = vpop.f32.mrb[0].mxu0 }
 0x259   :  { %v347_v38 = vpop.f32.mrb[1].mxu0 }
 0x25c   :  { %v1437_v27 = vpop.f32.mrb[2].mxu0 }
 0x25d   :  { %v357_v33 = vpop.f32.mrb[3].mxu0 }
 0x25e   :  { %376 = vrot.lane.b32.xlu1 %v357_v33, %s1767_s6 }
 0x262   :  { %378 = vrot.lane.b32.xlu1 %v1437_v27, %s1767_s6 }
 0x266   :  { %508 = vrot.lane.b32.xlu1 %v1972_v50, %s1766_s5 }
 0x2bb   :  { %v369_v28 = vpop.permute.xlu1 %368 }
 0x2bc   :  { %v382_v22 = vsel %vm135_vm0, %v347_v38, %v369_v28 }
 0x2bf   :  { %v371_v36 = vpop.permute.xlu0 %370 }
 0x2c0   :  { %v383_v37 = vsel %vm135_vm0, %v1434_v35, %v371_v36 }
 0x2d0   :  { %v377_v32 = vpop.permute.xlu1 %376 }
 0x2d1   :  { %v385_v39 = vsel %vm384_vm5, %v382_v22, %v377_v32 }
 0x2d4   :  { %v379_v40 = vpop.permute.xlu1 %378 }
 0x2d5   :  { %v386_v26 = vsel %vm384_vm5, %v383_v37, %v379_v40 }
 0x2d6   :  { %1760 = dma.done.wait [#allocation3], 2560 }
 0x2d7   :  { %1761 = vsyncadd [#allocation3], 4294964736  ;;  %vm414_vm6 = vcmask 785408   ;;  %504 = vrot.lane.b32.xlu0 %v1962_v48, %s1766_s5  ;;  %v2311_v43 = vmov 0   ;;  %1563 = vmatprep.subr.bf16.mxu1 %v1562_v31  ;;  %v1570_v0 = vpack.c.bf16 %v1840_v5, %v1835_v4  ;;  %v1574_v1 = vpack.c.bf16 %v1850_v7, %v1845_v6  ;;  %s1768_s0 = smov 96  }
 0x2d8   :  { %1724 = vset.pattern.permute.xlu1 %v2311_v43  ;;  %1462 = vmatprep.mubr.msk.f32.mxu1 %vm414_vm6, %v385_v39  ;;  %v1578_v2 = vpack.c.bf16 %v1860_v9, %v1855_v8  ;;  %v1582_v3 = vpack.c.bf16 %v1870_v11, %v1865_v10  ;;  %v509_v4 = vpop.permute.xlu1 %508  ;;  %v412_v8 = vsub.s32 6, %v2071_v45  ;;  %vm2175_vm7 = vmpackc.low %vm135_vm0, %vm135_vm0  ;;  %vm1155_vm8 = vcmask 130048  }
 0x2d9   :  { %1565 = vmatpush3.bf16.msra.mxu1 %v1562_v31  ;;  %510 = vrot.lane.b32.xlu1 %v1977_v51, %s1766_s5 }
 0x2da   :  { %1567 = vmatprep.subr.bf16.mxu1 %v1566_v41 }
 0x2db   :  { %506 = vrot.lane.b32.xlu0 %v1967_v49, %s1766_s5  ;;  %v413_v49 = vrot.slane %v2079_v25, %v412_v8 }
 0x2dd   :  { %1569 = vmatpush3.bf16.msra.mxu1 %v1566_v41  ;;  %514 = vrot.lane.b32.xlu1 %v1987_v53, %s1766_s5 }
 0x2de   :  { %1571 = vmatprep.subr.bf16.mxu1 %v1570_v0 }
 0x2df   :  { %512 = vrot.lane.b32.xlu0 %v1982_v52, %s1766_s5 }
 0x2e1   :  { %1573 = vmatpush3.bf16.msra.mxu1 %v1570_v0  ;;  %518 = vrot.lane.b32.xlu1 %v1997_v55, %s1766_s5 }
 0x2e2   :  { %1575 = vmatprep.subr.bf16.mxu1 %v1574_v1 }
 0x2e3   :  { %516 = vrot.lane.b32.xlu0 %v1992_v54, %s1766_s5 }
 0x2e5   :  { %1577 = vmatpush3.bf16.msra.mxu1 %v1574_v1 }
 0x2e6   :  { %1579 = vmatprep.subr.bf16.mxu1 %v1578_v2 }
 0x2e9   :  { %1581 = vmatpush3.bf16.msra.mxu1 %v1578_v2 }
 0x2ea   :  { %1583 = vmatprep.subr.bf16.mxu1 %v1582_v3 }
 0x2ed   :  { %1585 = vmatpush3.bf16.msra.mxu1 %v1582_v3 }
 0x2f0   :  { %1463 = vmatmul.mubr.msk.f32.vlgmr.msra.gmra.mrb[0].mxu1 %vm414_vm6, %v386_v26 }
 0x349   :  { %v505_v5 = vpop.permute.xlu0 %504 }
 0x34b   :  { %v511_v6 = vpop.permute.xlu1 %510 }
 0x34d   :  { %v507_v7 = vpop.permute.xlu0 %506 }
 0x34f   :  { %v515_v9 = vpop.permute.xlu1 %514 }
 0x351   :  { %v513_v48 = vpop.permute.xlu0 %512 }
 0x353   :  { %v519_v51 = vpop.permute.xlu1 %518 }
 0x355   :  { %v517_v11 = vpop.permute.xlu0 %516 }
 0x3c3   :  { %v1464_v50 = vpop.f32.mrb[0].mxu1 }
 0x3c4   :  { %v2159_v52 = vadd.f32 %v1464_v50, %v413_v49  ;;  %v487_v10 = vpop.f32.mrb[1].mxu1 }
 0x3c5   :  { %v2161_v53 = vadd.f32 %v487_v10, %v413_v49  ;;  %v1614_v10 = vpack.c.bf16 %v2017_v59, %v2012_v58 }
 0x3c6   :  { %v535_v54 = vmul.f32 %v519_v51, %v2159_v52  ;;  %v531_v55 = vmul.f32 %v511_v6, %v2159_v52  ;;  %v529_v46 = vmul.f32 %v507_v7, %v2159_v52  ;;  %v533_v30 = vmul.f32 %v515_v9, %v2159_v52 }
 0x3c7   :  { %v534_v19 = vmul.f32 %v517_v11, %v2161_v53  ;;  %1481 = vmatprep.mubr.msk.f32.mxu0 %vm135_vm0, %v2161_v53  ;;  %v530_v18 = vmul.f32 %v509_v4, %v2161_v53  ;;  %v528_v34 = vmul.f32 %v505_v5, %v2161_v53  ;;  %v532_v24 = vmul.f32 %v513_v48, %v2161_v53 }
 0x3c8   :  { %v1610_v51 = vpack.c.bf16 %v2007_v57, %v2002_v56  ;;  %v1622_v56 = vpack.c.bf16 %v2037_v63, %v2032_v62 }
 0x3c9   :  { %v1689_v42 = vpack.i.bf16 %v531_v55, %v530_v18  ;;  %v1684_v29 = vpack.i.bf16 %v529_v46, %v528_v34  ;;  %v1719_v35 = vpack.i.bf16 %v535_v54, %v534_v19  ;;  %v1714_v38 = vpack.i.bf16 %v533_v30, %v532_v24 }
 0x3ca   :  { %1611 = vmatprep.subr.bf16.mxu1 %v1610_v51 }
 0x3cb   :  { %1690 = vrot.lane.b32.xlu1 %v1689_v42, %s1768_s0  ;;  %1685 = vrot.lane.b32.xlu0 %v1684_v29, %s1768_s0 }
 0x3cc   :  { %1613 = vmatpush3.bf16.msra.mxu1 %v1610_v51 }
 0x3cd   :  { %1615 = vmatprep.subr.bf16.mxu1 %v1614_v10 }
 0x3cf   :  { %1700 = vrot.lane.b32.xlu1 %v1719_v35, %s1768_s0  ;;  %1695 = vrot.lane.b32.xlu0 %v1714_v38, %s1768_s0 }
 0x3d0   :  { %1617 = vmatpush3.bf16.msra.mxu1 %v1614_v10 }
 0x43d   :  { %v1691_v27 = vpop.permute.xlu1 %1690  ;;  %v1686_v33 = vpop.permute.xlu0 %1685 }
 0x43e   :  { %v1693_v28 = vunpack.i.h.bf16 %v1691_v27  ;;  %v1692_v22 = vunpack.i.l.bf16 %v1691_v27  ;;  %v1688_v32 = vunpack.i.h.bf16 %v1686_v33  ;;  %v1687_v36 = vunpack.i.l.bf16 %v1686_v33 }
 0x440   :  { %v1586_v37 = vpack.c.bf16 %v1688_v32, %v1687_v36  ;;  %v1592_v40 = vpack.c.bf16 %v1693_v28, %v1692_v22 }
 0x441   :  { %v1696_v26 = vpop.permute.xlu0 %1695  ;;  %v1701_v1 = vpop.permute.xlu1 %1700 }
 0x442   :  { %1588 = vmatprep.subr.msk.bf16.mxu0 %vm2175_vm7, %v1586_v37  ;;  %v1698_v31 = vunpack.i.h.bf16 %v1696_v26  ;;  %v1697_v41 = vunpack.i.l.bf16 %v1696_v26  ;;  %v1703_v2 = vunpack.i.h.bf16 %v1701_v1  ;;  %v1702_v3 = vunpack.i.l.bf16 %v1701_v1 }
 0x443   :  { %1591 = vmatpush3.bf16.xpose.msk.msra.mxu0 %vm2175_vm7, %v1586_v37 }
 0x444   :  { %1594 = vmatprep.subr.msk.bf16.mxu0 %vm2175_vm7, %v1592_v40  ;;  %v1598_v0 = vpack.c.bf16 %v1698_v31, %v1697_v41  ;;  %v1604_v4 = vpack.c.bf16 %v1703_v2, %v1702_v3 }
 0x44b   :  { %1597 = vmatpush3.bf16.xpose.msk.msra.mxu0 %vm2175_vm7, %v1592_v40 }
 0x44c   :  { %1600 = vmatprep.subr.msk.bf16.mxu0 %vm2175_vm7, %v1598_v0 }
 0x453   :  { %1603 = vmatpush3.bf16.xpose.msk.msra.mxu0 %vm2175_vm7, %v1598_v0 }
 0x454   :  { %1606 = vmatprep.subr.msk.bf16.mxu0 %vm2175_vm7, %v1604_v4 }
 0x45b   :  { %1609 = vmatpush3.bf16.xpose.msk.msra.mxu0 %vm2175_vm7, %v1604_v4 }
 0x462   :  { %1482 = vmatmul.mubr.msk.f32.vlgmr.msra.gmra.mrb[4].mxu0 %vm135_vm0, %v2159_v52 }
 0x535   :  { %v1483_v5 = vpop.f32.mrb[4].mxu0 }
 0x536   :  { %v658_v6 = vmul.f32 0.35355338, %v1483_v5  ;;  %v648_v7 = vpop.f32.mrb[5].mxu0 }
 0x537   :  { %v657_v8 = vmul.f32 0.35355338, %v648_v7 }
 0x538   :  { %v660_v9 = vadd.f32 %v658_v6, %v2047_v21 }
 0x539   :  { %v659_v48 = vadd.f32 %v657_v8, %v2042_v20  ;;  %v1618_v20 = vpack.c.bf16 %v2027_v61, %v2022_v60 }
 0x53a   :  { %v664_v49 = vsel %vm384_vm5, %v660_v9, -inf }
 0x53b   :  { %665 = vmax.xlane.f32.xlu1 %v664_v49  ;;  %v661_v50 = vsel %vm384_vm5, %v659_v48, -inf  ;;  %1619 = vmatprep.subr.bf16.mxu1 %v1618_v20 }
 0x53c   :  { %662 = vmax.xlane.f32.xlu0 %v661_v50  ;;  %1621 = vmatpush3.bf16.msra.mxu1 %v1618_v20 }
 0x53d   :  { %1623 = vmatprep.subr.bf16.mxu1 %v1622_v56 }
 0x540   :  { %1625 = vmatpush3.bf16.msra.mxu1 %v1622_v56 }
 0x54c   :  { %1710 = vrot.lane.b32.xlu1 %v1689_v42, %s1767_s6 }
 0x550   :  { %1720 = vrot.lane.b32.xlu1 %v1719_v35, %s1767_s6 }
 0x552   :  { %1705 = vrot.lane.b32.xlu0 %v1684_v29, %s1767_s6 }
 0x556   :  { %1715 = vrot.lane.b32.xlu0 %v1714_v38, %s1767_s6 }
 0x5c8   :  { %v666_v57 = vpop.xlane.xlu1 %665 }
 0x5c9   :  { %v668_v58 = vsub.f32 %v660_v9, %v666_v57  ;;  %v663_v59 = vpop.xlane.xlu0 %662 }
 0x5ca   :  { %v667_v21 = vsub.f32 %v659_v48, %v663_v59 }
 0x5cb   :  { %v671_v11 = vmul.f32 1.442695, %v668_v58 }
 0x5cc   :  { %v669_v54 = vmul.f32 1.442695, %v667_v21  ;;  %v1711_v55 = vpop.permute.xlu1 %1710 }
 0x5cd   :  { %v1713_v46 = vunpack.i.h.bf16 %v1711_v55  ;;  %v1706_v60 = vpop.permute.xlu0 %1705  ;;  %v1712_v61 = vunpack.i.l.bf16 %v1711_v55 }
 0x5ce   :  { %1726 = vpow2.f32 %v669_v54  ;;  %v1708_v30 = vunpack.i.h.bf16 %v1706_v60  ;;  %v1707_v19 = vunpack.i.l.bf16 %v1706_v60 }
 0x5cf   :  { %1728 = vpow2.f32 %v671_v11  ;;  %v1630_v63 = vpack.c.bf16 %v1713_v46, %v1712_v61 }
 0x5d0   :  { %v1626_v18 = vpack.c.bf16 %v1708_v30, %v1707_v19  ;;  %v1721_v42 = vpop.permute.xlu1 %1720 }
 0x5d1   :  { %v1716_v62 = vpop.permute.xlu0 %1715  ;;  %v1723_v29 = vunpack.i.h.bf16 %v1721_v42  ;;  %v1722_v35 = vunpack.i.l.bf16 %v1721_v42 }
 0x5d2   :  { %v1718_v34 = vunpack.i.h.bf16 %v1716_v62  ;;  %v1717_v24 = vunpack.i.l.bf16 %v1716_v62  ;;  %1627 = vmatprep.subr.bf16.mxu0 %v1626_v18 }
 0x5d3   :  { %1629 = vmatpush3.bf16.msra.mxu0 %v1626_v18  ;;  %v1638_v28 = vpack.c.bf16 %v1723_v29, %v1722_v35  ;;  %v1642_v29 = vpack.c.bf16 %v1880_v13, %v1875_v12  ;;  %v1646_v35 = vpack.c.bf16 %v1890_v15, %v1885_v14 }
 0x5d4   :  { %1631 = vmatprep.subr.bf16.mxu0 %v1630_v63  ;;  %v1634_v38 = vpack.c.bf16 %v1718_v34, %v1717_v24  ;;  %v931_v24 = vsub.s32 4, %v2071_v45 }
 0x5d5   :  { %1643 = vmatprep.subr.bf16.mxu1 %v1642_v29 }
 0x5d6   :  { %v932_v42 = vrot.slane %v2079_v25, %v931_v24 }
 0x5d7   :  { %1633 = vmatpush3.bf16.msra.mxu0 %v1630_v63  ;;  %v941_v63 = vsub.s32 5, %v2071_v45 }
 0x5d8   :  { %v1727_v27 = vpop.eup %1726  ;;  %1635 = vmatprep.subr.bf16.mxu0 %v1634_v38 }
 0x5d9   :  { %v1729_v33 = vpop.eup %1728  ;;  %1500 = vmatprep.mubr.msk.f32.mxu1 %vm384_vm5, %v1727_v27  ;;  %v942_v34 = vrot.slane %v2079_v25, %v941_v63 }
 0x5da   :  { %1501 = vmatmul.mubr.msk.f32.vlgmr.msra.gmra.mrb[2].mxu1 %vm384_vm5, %v1729_v33 }
 0x5db   :  { %1637 = vmatpush3.bf16.msra.mxu0 %v1634_v38  ;;  %1645 = vmatpush3.bf16.msra.mxu1 %v1642_v29  ;;  %v2320_v29 = vld [vmem:[#allocation13_spill] sm:$0xff] }
 0x5dc   :  { %1639 = vmatprep.subr.bf16.mxu0 %v1638_v28  ;;  %1647 = vmatprep.subr.bf16.mxu1 %v1646_v35 }
 0x5df   :  { %1641 = vmatpush3.bf16.msra.mxu0 %v1638_v28  ;;  %1649 = vmatpush3.bf16.msra.mxu1 %v1646_v35 }
 0x6ad   :  { %v1502_v22 = vpop.f32.mrb[2].mxu1 }
 0x6ae   :  { %v755_v32 = vmax.f32 %v1502_v22, 1e-30  ;;  %v745_v36 = vpop.f32.mrb[3].mxu1 }
 0x6af   :  { %v754_v39 = vmax.f32 %v745_v36, 1e-30  ;;  %v1650_v36 = vpack.c.bf16 %v1900_v17, %v1895_v16  ;;  %v2315_v17 = vld [vmem:[#allocation9_spill] sm:$0xff] }
 0x6b0   :  { %1730 = vrcp.f32 %v755_v32 }
 0x6b1   :  { %1732 = vrcp.f32 %v754_v39  ;;  %1651 = vmatprep.subr.bf16.mxu1 %v1650_v36 }
 0x6ba   :  { %v1731_v37 = vpop.eup %1730 }
 0x6bb   :  { %v1733_v40 = vpop.eup %1732  ;;  %v759_v26 = vmul.f32 %v1731_v37, %v755_v32 }
 0x6bc   :  { %v758_v31 = vmul.f32 %v1733_v40, %v754_v39 }
 0x6bd   :  { %v761_v41 = vsub.f32 2.0, %v759_v26 }
 0x6be   :  { %v760_v0 = vsub.f32 2.0, %v758_v31 }
 0x6bf   :  { %v763_v1 = vmul.f32 %v1731_v37, %v761_v41 }
 0x6c0   :  { %v762_v2 = vmul.f32 %v1733_v40, %v760_v0  ;;  %v2314_v0 = vld [vmem:[#allocation12_spill] sm:$0xff] }
 0x6c1   :  { %v765_v3 = vmul.f32 %v763_v1, %v755_v32 }
 0x6c2   :  { %v764_v4 = vmul.f32 %v762_v2, %v754_v39 }
 0x6c3   :  { %v767_v5 = vsub.f32 2.0, %v765_v3 }
 0x6c4   :  { %v766_v6 = vsub.f32 2.0, %v764_v4  ;;  %v951_v4 = vsub.s32 7, %v2071_v45 }
 0x6c5   :  { %v769_v7 = vmul.f32 %v767_v5, %v763_v1  ;;  %v2316_v1 = vld [vmem:[#allocation10_spill] sm:$0xff] }
 0x6c6   :  { %v768_v8 = vmul.f32 %v766_v6, %v762_v2  ;;  %v1654_v2 = vpack.c.bf16 %v2316_v1, %v2315_v17  ;;  %v952_v5 = vrot.slane %v2079_v25, %v951_v4  ;;  %v1254_v25 = vld [vmem:[%s2294_s3 + $0x8] sm:$0xff] }
 0x6c7   :  { %v771_v48 = vmul.f32 %v1729_v33, %v769_v7 }
 0x6c8   :  { %v770_v9 = vmul.f32 %v1727_v27, %v768_v8 }
 0x6ca   :  { %1519 = vmatprep.mubr.msk.f32.mxu0 %vm384_vm5, %v770_v9 }
 0x6cb   :  { %1520 = vmatmul.mubr.msk.f32.vlgmr.msra.gmra.mrb[6].mxu0 %vm384_vm5, %v771_v48 }
 0x79e   :  { %v1521_v49 = vpop.f32.mrb[6].mxu0 }
 0x79f   :  { %881 = vrot.lane.b32.xlu1 %v1521_v49, %s1767_s6  ;;  %v868_v50 = vpop.f32.mrb[7].mxu0  ;;  %v1253_v49 = vld [vmem:[%s2294_s3] sm:$0xff] }
 0x7a0   :  { %879 = vrot.lane.b32.xlu0 %v868_v50, %s1767_s6  ;;  %v1255_v50 = vld [vmem:[%s2294_s3 + $0x10] sm:$0xff] }
 0x811   :  { %v882_v51 = vpop.permute.xlu1 %881 }
 0x812   :  { %v886_v10 = vadd.f32 %v882_v51, %v2159_v52  ;;  %v880_v20 = vpop.permute.xlu0 %879  ;;  %v1256_v51 = vld [vmem:[%s2294_s3 + $0x18] sm:$0xff]  ;;  %s1769_s3 = smov [#allocation4]  }
 0x813   :  { %v885_v56 = vadd.f32 %v880_v20, %v2161_v53  ;;  %v2318_v20 = vld [vmem:[#allocation11_spill] sm:$0xff]  ;;  %s1298_s10 = sshll.u32 %s1769_s3, 4  ;;  %s1299_s10 = int_to_ptr.vmem [resolvable:$true] %s1298_s10 }
 0x814   :  { %891 = vrot.lane.b32.xlu1 %v886_v10, %s1767_s6  ;;  %s1738_s11 = scalar_lea.vmem %s1299_s10, 512  ;;  %p1743_p1 = scmp.lt.s32.totalorder %s1299_s10, %s1299_s10 }
 0x815   :  { %889 = vrot.lane.b32.xlu0 %v885_v56, %s1767_s6  ;;  %p1739_p0 = scmp.ne.s32.totalorder %s1299_s10, %s1738_s11  ;;  %p1744_p2 = scmp.lt.s32.totalorder %s1738_s11, %s1738_s11 }
 0x817   :  { %p1745_p3 = por %p1744_p2, %p1743_p1 }
 0x819   :  { %p1746_p4 = pnand %p1745_p3, %p1739_p0 }
 0x886   :  { %v892_v57 = vpop.permute.xlu1 %891 }
 0x887   :  { %v890_v58 = vpop.permute.xlu0 %889  ;;  %v898_v59 = vsel %vm135_vm0, %v892_v57, 0.0 }
 0x888   :  { %899 = vadd.xlane.f32.xlu1 %v898_v59  ;;  %v895_v21 = vsel %vm135_vm0, %v890_v58, 0.0 }
 0x889   :  { %896 = vadd.xlane.f32.xlu0 %v895_v21 }
 0x915   :  { %v900_v11 = vpop.xlane.xlu1 %899 }
 0x916   :  { %v902_v54 = vmul.f32 0.03125, %v900_v11  ;;  %v897_v55 = vpop.xlane.xlu0 %896 }
 0x917   :  { %v901_v46 = vmul.f32 0.03125, %v897_v55 }
 0x918   :  { %v904_v52 = vsub.f32 %v886_v10, %v902_v54  ;;  %v2317_v10 = vsub.s32 0, %v2071_v45 }
 0x919   :  { %v903_v60 = vsub.f32 %v885_v56, %v901_v46 }
 0x91a   :  { %v906_v61 = vmul.f32 %v904_v52, %v904_v52  ;;  %v1043_v56 = vrot.slane %v2318_v20, %v2317_v10 }
 0x91b   :  { %v905_v53 = vmul.f32 %v903_v60, %v903_v60 }
 0x91c   :  { %911 = vrot.lane.b32.xlu1 %v906_v61, %s1767_s6 }
 0x91d   :  { %909 = vrot.lane.b32.xlu0 %v905_v53, %s1767_s6 }
 0x98e   :  { %v912_v30 = vpop.permute.xlu1 %911 }
 0x98f   :  { %v910_v19 = vpop.permute.xlu0 %909  ;;  %v918_v18 = vsel %vm135_vm0, %v912_v30, 0.0 }
 0x990   :  { %919 = vadd.xlane.f32.xlu1 %v918_v18  ;;  %v915_v62 = vsel %vm135_vm0, %v910_v19, 0.0 }
 0x991   :  { %916 = vadd.xlane.f32.xlu0 %v915_v62 }
 0x9a1   :  { %944 = vrot.lane.b32.xlu1 %v942_v34, %s1767_s6  ;;  %v2319_v34 = vld [vmem:[#allocation14_spill] sm:$0xff] }
 0x9a7   :  { %934 = vrot.lane.b32.xlu0 %v932_v42, %s1767_s6 }
 0xa1d   :  { %v920_v38 = vpop.xlane.xlu1 %919 }
 0xa1e   :  { %v922_v27 = vmul.f32 0.03125, %v920_v38  ;;  %v917_v33 = vpop.xlane.xlu0 %916 }
 0xa1f   :  { %v921_v28 = vmul.f32 0.03125, %v917_v33 }
 0xa20   :  { %v924_v22 = vadd.f32 1e-05, %v922_v27 }
 0xa21   :  { %v923_v32 = vadd.f32 1e-05, %v921_v28  ;;  %v945_v37 = vpop.permute.xlu1 %944 }
 0xa22   :  { %1734 = vrsqrt.f32 %v924_v22  ;;  %v935_v13 = vpop.permute.xlu0 %934 }
 0xa23   :  { %1736 = vrsqrt.f32 %v923_v32 }
 0xa2c   :  { %v1735_v12 = vpop.eup %1734 }
 0xa2d   :  { %v1737_v39 = vpop.eup %1736  ;;  %v928_v14 = vmul.f32 %v1735_v12, %v904_v52 }
 0xa2e   :  { %v927_v15 = vmul.f32 %v1737_v39, %v903_v60 }
 0xa2f   :  { %v938_v40 = vmul.f32 %v935_v13, %v928_v14 }
 0xa30   :  { %v937_v26 = vmul.f32 %v935_v13, %v927_v15 }
 0xa31   :  { %v948_v31 = vadd.f32 %v945_v37, %v938_v40 }
 0xa32   :  { %v947_v41 = vadd.f32 %v945_v37, %v937_v26 }
 0xa33   :  { %957 = vrot.lane.b32.xlu1 %v948_v31, %s1767_s6 }
 0xa34   :  { %955 = vrot.lane.b32.xlu0 %v947_v41, %s1767_s6 }
 0xa37   :  { %1259 = vperm.xlu1 %1724, %v1253_v49  }
 0xa3b   :  { %1264 = vperm.xlu1 %1724, %v1254_v25  }
 0xa3f   :  { %1269 = vperm.xlu1 %1724, %v1255_v50  }
 0xa43   :  { %1274 = vperm.xlu1 %1724, %v1256_v51  }
 0xa52   :  { %1123 = vxpose.xlu0.b32.start [1/2] (short) (narrow) %v2314_v0, 32 }
 0xa56   :  { %1124 = vxpose.xlu0.b32.end [2/2] (short) (narrow) %v2073_v23, 32 }
 0xa7f   :  { %1725 = vset.pattern.permute.xlu0 %v2311_v43 }
 0xaa5   :  { %v958_v3 = vpop.permute.xlu1 %957 }
 0xaa6   :  { %v956_v16 = vpop.permute.xlu0 %955 }
 0xaa7   :  { %1530 = vmatprep.mubr.msk.f32.mxu1 %vm135_vm0, %v956_v16 }
 0xaa8   :  { %1531 = vmatmul.mubr.msk.f32.vlgmr.msra.gmra.mrb[4].mxu1 %vm135_vm0, %v958_v3 }
 0xaa9   :  { %1653 = vmatpush3.bf16.xpose.msra.mxu1 %v1650_v36 }
 0xaaa   :  { %1655 = vmatprep.subr.bf16.mxu1 %v1654_v2 }
 0xab1   :  { %1657 = vmatpush3.bf16.xpose.msra.mxu1 %v1654_v2 }
 0xab6   :  { %v1260_v45 = vpop.permute.xlu1 %1259 }
 0xaba   :  { %v1265_v61 = vpop.permute.xlu1 %1264 }
 0xabe   :  { %v1270_v53 = vpop.permute.xlu1 %1269 }
 0xac2   :  { %v1275_v63 = vpop.permute.xlu1 %1274 }
 0xad2   :  { %v1139_v48 = vpop.trf.xlu0 }
 0xad3   :  { %1548 = vmatprep.mubr.msk.f32.mxu0 %vm1155_vm8, %v1139_v48 }
 0xad6   :  { %v1140_v21 = vpop.trf.xlu0 }
 0xada   :  { %v1141_v52 = vpop.trf.xlu0 }
 0xade   :  { %v1142_v60 = vpop.trf.xlu0 }
 0xb7b   :  { %v1532_v6 = vpop.f32.mrb[4].mxu1 }
 0xb7c   :  { %v1035_v23 = vadd.f32 %v1532_v6, %v952_v5  ;;  %v1029_v7 = vpop.f32.mrb[5].mxu1 }
 0xb7d   :  { %v1030_v43 = vadd.f32 %v1029_v7, %v952_v5 }
 0xb7e   :  { %v1039_v9 = vmax.f32 %v1035_v23, 0.0 }
 0xb7f   :  { %v1038_v8 = vmax.f32 %v1030_v43, 0.0 }
 0xb81   :  { %1541 = vmatprep.mubr.f32.mxu1 %v1038_v8 }
 0xb82   :  { %1542 = vmatmul.mubr.f32.vlgmr.msra.gmra.mrb[6].mxu1 %v1039_v9 }
 0xc55   :  { %v1543_v57 = vpop.f32.mrb[6].mxu1 }
 0xc56   :  { %v1116_v58 = vadd.f32 %v1543_v57, %v1043_v56  ;;  %v1110_v59 = vpop.f32.mrb[7].mxu1 }
 0xc57   :  { %v1111_v11 = vadd.f32 %v1110_v59, %v1043_v56 }
 0xc58   :  { %v1122_v54 = vadd.f32 %v1116_v58, %v958_v3 }
 0xc59   :  { %v1121_v55 = vadd.f32 %v1111_v11, %v956_v16 }
 0xc5b   :  { %v1658_v46 = vpack.c.bf16 %v1122_v54, %v1121_v55 }
 0xc5d   :  { %1659 = vmatprep.subr.bf16.mxu0 %v1658_v46 }
 0xc5e   :  { %1661 = vmatpush3.bf16.msra.mxu0 %v1658_v46 }
 0xc61   :  { %1549 = vmatmul.mubr.msk.f32.vlgmr.msra.gmra.mrb[8].mxu0 %vm1155_vm8, %v1140_v21 }
 0xc62   :  { %1551 = vmatprep.mubr.msk.f32.mxu0 %vm1155_vm8, %v1141_v52 }
 0xc65   :  { %1552 = vmatmul.mubr.msk.f32.gmra.mrb[10].mxu0 %vm1155_vm8, %v1142_v60 }
 0xd34   :  { %v1550_v30 = vpop.f32.mrb[8].mxu0 }
 0xd35   :  { %v1278_v19 = vmul.f32 %v1550_v30, %v1265_v61  ;;  %v1234_v18 = vpop.f32.mrb[9].mxu0 }
 0xd36   :  { %v1277_v62 = vmul.f32 %v1260_v45, %v1234_v18 }
 0xd37   :  { %vm1282_vm9 = vcmp.ne.f32.partialorder %v1278_v19, 0.0 }
 0xd38   :  { %v1286_v24 = vsel %vm1282_vm9, %v1278_v19, %v2319_v34  ;;  %vm1281_vm10 = vcmp.ne.f32.partialorder %v1277_v62, 0.0  ;;  %v1553_v42 = vpop.f32.mrb[10].mxu0 }
 0xd39   :  { %1290 = vst.msk [vmem:[#allocation4 + $0x8] sm:$0xff] %vm135_vm0, %v1286_v24  ;;  %v1285_v35 = vsel %vm1281_vm10, %v1277_v62, %v2320_v29  ;;  %v1280_v38 = vmul.f32 %v1553_v42, %v1275_v63  ;;  %v1244_v27 = vpop.f32.mrb[11].mxu0 }
 0xd3a   :  { %1289 = vst.msk [vmem:[#allocation4] sm:$0xff] %vm135_vm0, %v1285_v35  ;;  %v1279_v33 = vmul.f32 %v1270_v53, %v1244_v27 }
 0xd3b   :  { %vm1284_vm11 = vcmp.ne.f32.partialorder %v1280_v38, 0.0 }
 0xd3c   :  { %v1288_v28 = vsel %vm1284_vm11, %v1280_v38, %v2102_v44  ;;  %vm1283_vm12 = vcmp.ne.f32.partialorder %v1279_v33, 0.0 }
 0xd3d   :  { %1292 = vst.msk [vmem:[#allocation4 + $0x18] sm:$0xff] %vm135_vm0, %v1288_v28  ;;  %v1287_v22 = vsel %vm1283_vm12, %v1279_v33, %v2100_v47 }
 0xd3e   :  { %1291 = vst.msk [vmem:[#allocation4 + $0x10] sm:$0xff] %vm135_vm0, %v1287_v22 }
 0xd3f   :  { %1749 = shalt.err (!%p1746_p4)
}
 0xd40   :  { %s1750_s14 = scalar_lea.hbm %s2298_s7, 512 }
 0xd41   :  { %p1751_p5 = scmp.ne.s32.totalorder %s2298_s7, %s1750_s14  ;;  %p1754_p6 = scmp.lt.u32.totalorder %s1750_s14, %s2298_s7 }
 0xd43   :  { %p1756_p7 = pnand %p1754_p6, %p1751_p5 }
 0xd45   :  { %1759 = shalt.err (!%p1756_p7)
}
 0xd46   :  { %s1770_s19 = smov 128   ;;  %s1771_s20 = smov 8  }
 0xd47   :  { %1304 = dma.vmem_to_hbm [thread:$0]  %s1299_s10, 512, %s2298_s7, [#allocation5], %s1770_s19, %s1770_s19, %s1771_s20  }
 0xd48   :  { %1762 = dma.done.wait [#allocation5], 512  }
 0xd49   :  { %1763 = vsyncadd [#allocation5], 4294966784 }
 0xd4a   :  { %1308 = vsyncpa [#allocation5], 1 }
 0xd4b   :  { %1309 = vsyncmov [#allocation3] }
 0xd4e   :  { %s1310_s22 = vpop.sfrf %1309 }
 0xd4f   :  { %p1353_p8 = scmp.ne.s32.totalorder %s1310_s22, 0 }
 0xd51   :  { %1314 = shalt.err (%p1353_p8)  }

</bundles_post_ra>
